<compile_context>
chip_gen: v7x
topology: tpu7x:2x2x1
jax: 0.10.0
libtpu: 0.0.40
codegen_flags: <defaults>
</compile_context>

<pallas_src>
import functools

import jax
import jax.numpy as jnp
from jax import lax
from jax.experimental import pallas as pl
from jax.experimental.pallas import tpu as pltpu

# Small VGG-style feature config: conv(out_ch) or 'M' (maxpool 2x2, stride 2).
CFG = [8, 'M', 16, 'M', 32, 'M']

LANE = 128          # TPU lane width (pad Cout to this for lane-dense stores)
TILE_M_MAX = 512    # max output rows per grid step (VMEM-friendly)


def _round_up(x, m):
    return (x + m - 1) // m * m


def _pick_tile(m, max_tile=TILE_M_MAX):
    """Largest tile: full extent if small, else a multiple of 8 dividing m."""
    if m <= max_tile:
        return m
    for t in range(max_tile, 7, -8):
        if m % t == 0:
            return t
    return m


# ---------------------------------------------------------------------------
# Pallas kernel: fused (conv3x3 as one K=9*Cin matmul) + bias + ReLU
#                [+ 2x2/2 maxpool when n_taps == 4]
# ---------------------------------------------------------------------------
def _conv_taps_kernel(x_ref, w_ref, b_ref, o_ref, *, n_taps):
    # x_ref: (n_taps, TILE, K)  w_ref: (K, Cp)  b_ref: (1, Cp)  o_ref: (TILE, Cp)
    w = w_ref[...]          # resident weights (hoisted once per tile)
    b = b_ref[...]

    def act(t):
        y = jnp.dot(x_ref[t], w, preferred_element_type=jnp.float32)
        return jnp.maximum(y + b, 0.0)          # bias + ReLU

    r = act(0)
    for t in range(1, n_taps):                  # static unroll: pool-window max
        r = jnp.maximum(r, act(t))
    o_ref[...] = r                              # lane-dense store (Cp = 128k)


def conv3x3_relu_pallas(x_nhwc, w_hwio, b, *, pool):
    """3x3 conv (pad=1, stride=1) + bias + ReLU, optionally fused 2x2 maxpool.

    x: (N, H, W, Cin) f32  ->  (N, Ho, Wo, Cout) f32
    """
    N, H, W, Cin = x_nhwc.shape
    KH, KW, _, Cout = w_hwio.shape
    K = KH * KW * Cin
    Cp = _round_up(Cout, LANE)

    # XLA glue: single K = 9*Cin im2col slab (one matmul per tile instead of a
    # 9-step reduction grid).  K index = (kh*KW + kw)*Cin + cin, matching the
    # HWIO weight reshape below.
    xp = jnp.pad(x_nhwc, ((0, 0), (1, 1), (1, 1), (0, 0)))
    cols = jnp.concatenate(
        [xp[:, kh:kh + H, kw:kw + W, :] for kh in range(KH) for kw in range(KW)],
        axis=-1,
    )  # (N, H, W, K)

    if pool:
        Ho, Wo = H // 2, W // 2
        Mo = N * Ho * Wo
        # Regroup im2col rows into the 4 pool-tap slabs; the kernel takes the
        # elementwise max after bias+ReLU, so the full-resolution activation
        # never touches HBM.
        taps = [
            cols[:, dh:dh + 2 * Ho:2, dw:dw + 2 * Wo:2, :].reshape(Mo, K)
            for dh in range(2) for dw in range(2)
        ]
        x_in = jnp.stack(taps, axis=0)            # (4, Mo, K)
        n_taps = 4
    else:
        Ho, Wo = H, W
        Mo = N * Ho * Wo
        x_in = cols.reshape(1, Mo, K)             # (1, Mo, K)
        n_taps = 1

    # Weights / bias: fold taps into K and lane-pad the output channels.
    w_mat = w_hwio.reshape(K, Cout)
    w_p = jnp.pad(w_mat, ((0, 0), (0, Cp - Cout)))
    b_p = jnp.pad(b, (0, Cp - Cout)).reshape(1, Cp)

    tile = _pick_tile(Mo)
    grid = (Mo // tile,)

    out = pl.pallas_call(
        functools.partial(_conv_taps_kernel, n_taps=n_taps),
        out_shape=jax.ShapeDtypeStruct((Mo, Cp), jnp.float32),
        grid=grid,
        in_specs=[
            pl.BlockSpec((n_taps, tile, K), lambda i: (0, i, 0)),
            pl.BlockSpec((K, Cp), lambda i: (0, 0)),     # resident weights
            pl.BlockSpec((1, Cp), lambda i: (0, 0)),     # resident bias
        ],
        out_specs=pl.BlockSpec((tile, Cp), lambda i: (i, 0)),
        compiler_params=pltpu.CompilerParams(
            dimension_semantics=("parallel",),           # split across TCs (v7x)
        ),
    )(x_in, w_p, b_p)

    # Slice off the lane padding before handing to the next layer.
    return out[:, :Cout].reshape(N, Ho, Wo, Cout)


# ---------------------------------------------------------------------------
# Parameters (deterministic, mirrors the PyTorch __init__)
# ---------------------------------------------------------------------------
def init_vgg_params(key, cfg, in_channels=3):
    params = []
    for v in cfg:
        if v == 'M':
            continue
        key, k1 = jax.random.split(key)
        n = 3 * 3 * v  # kh * kw * out_channels, as in the PyTorch module
        w = jax.random.normal(k1, (v, in_channels, 3, 3), jnp.float32) * jnp.sqrt(
            2.0 / n
        )  # OIHW, normal(0, sqrt(2/n))
        b = jnp.zeros((v,), jnp.float32)   # bias zeroed
        mask = jnp.ones_like(w)            # all-ones mask from init_some/set_masks
        params.append((w, b, mask))
        in_channels = v
    return params


# ---------------------------------------------------------------------------
# Forward passes
# ---------------------------------------------------------------------------
def vgg_forward_pallas(x_nchw, params, cfg):
    x = jnp.transpose(x_nchw, (0, 2, 3, 1))  # NCHW -> NHWC for the kernels
    pi = 0
    i = 0
    while i < len(cfg):
        v = cfg[i]
        if v == 'M':
            # Standalone pool (not hit by this cfg: pools fuse into the conv).
            N, H, W, C = x.shape
            Ho, Wo = H // 2, W // 2
            x = x[:, :2 * Ho, :2 * Wo, :].reshape(N, Ho, 2, Wo, 2, C).max(axis=(2, 4))
            i += 1
        else:
            w, b, mask = params[pi]
            pi += 1
            pool = (i + 1 < len(cfg)) and (cfg[i + 1] == 'M')
            w_eff = w * mask                              # MaskedConv2d (mask==1)
            w_hwio = jnp.transpose(w_eff, (2, 3, 1, 0))   # OIHW -> HWIO
            x = conv3x3_relu_pallas(x, w_hwio, b, pool=pool)
            i += 2 if pool else 1
    # torch: x.view(x.size(0), -1) over NCHW output
    x_nchw_out = jnp.transpose(x, (0, 3, 1, 2))
    return x_nchw_out.reshape(x_nchw_out.shape[0], -1)


def vgg_forward_ref(x_nchw, params, cfg):
    """Pure-JAX reference (no Pallas) for correctness checking."""
    x = x_nchw
    pi = 0
    for v in cfg:
        if v == 'M':
            x = lax.reduce_window(
                x, -jnp.inf, lax.max, (1, 1, 2, 2), (1, 1, 2, 2), 'VALID'
            )
        else:
            w, b, mask = params[pi]
            pi += 1
            x = lax.conv_general_dilated(
                x, w * mask, (1, 1), ((1, 1), (1, 1)),
                dimension_numbers=('NCHW', 'OIHW', 'NCHW'),
            )
            x = jnp.maximum(x + b[None, :, None, None], 0.0)
    return x.reshape(x.shape[0], -1)


# NOTE: com_mask / com_mask2 / com_mask3 / set_masks are host-side pruning
# utilities (numpy percentiles over filter norms) that do not participate in
# the forward pass; they are not kernel code.

if __name__ == "__main__":
    key = jax.random.PRNGKey(0)
    kx, kp = jax.random.split(key)

    # Small shapes consistent with the module: batch=2, 3 input channels, 16x16.
    x = jax.random.normal(kx, (2, 3, 16, 16), jnp.float32)
    params = init_vgg_params(kp, CFG, in_channels=3)

    fwd = jax.jit(lambda xx: vgg_forward_pallas(xx, params, CFG))
    out = jax.block_until_ready(fwd(x))

    ref = vgg_forward_ref(x, params, CFG)

    assert out.shape == (2, 32 * 2 * 2), out.shape
    if not jnp.allclose(out, ref, rtol=1e-3, atol=1e-3):
        raise AssertionError("Pallas VGG output mismatch vs JAX reference")

    print("KERNEL_OK")
</pallas_src>

<mosaic_0001>
module attributes {stable_mosaic.version = 11 : i64} {
  func.func @_conv_taps_kernel(%arg0: i32, %arg1: memref<4x128x27xf32, #tpu.memory_space<vmem>>, %arg2: memref<27x128xf32, #tpu.memory_space<vmem>>, %arg3: memref<1x128xf32, #tpu.memory_space<vmem>>, %arg4: memref<128x128xf32, #tpu.memory_space<vmem>>) attributes {dimension_semantics = [#tpu.dimension_semantics<parallel>], iteration_bounds = array<i64: 1>, scalar_prefetch = 0 : i64, scratch_operands = 0 : i64, tpu.core_type = #tpu.core_type<tc>, window_params = [{transform_indices = @transform_0, window_bounds = array<i64: 4, 128, 27>}, {pipeline_mode = #tpu.pipeline_mode<synchronous>, transform_indices = @transform_1, window_bounds = array<i64: 27, 128>}, {pipeline_mode = #tpu.pipeline_mode<synchronous>, transform_indices = @transform_2, window_bounds = array<i64: 1, 128>}, {transform_indices = @transform_3, window_bounds = array<i64: 128, 128>}]} {
    %c0 = arith.constant 0 : index
    %c0_0 = arith.constant 0 : index
    %0 = vector.load %arg2[%c0, %c0_0] : memref<27x128xf32, #tpu.memory_space<vmem>>, vector<27x128xf32>
    %c0_1 = arith.constant 0 : index
    %c0_2 = arith.constant 0 : index
    %1 = vector.load %arg3[%c0_1, %c0_2] : memref<1x128xf32, #tpu.memory_space<vmem>>, vector<1x128xf32>
    %c0_3 = arith.constant 0 : index
    %c0_4 = arith.constant 0 : index
    %c0_5 = arith.constant 0 : index
    %2 = vector.load %arg1[%c0_3, %c0_4, %c0_5] : memref<4x128x27xf32, #tpu.memory_space<vmem>>, vector<1x128x27xf32>
    %3 = vector.shape_cast %2 : vector<1x128x27xf32> to vector<128x27xf32>
    %cst = arith.constant dense<0.000000e+00> : vector<128x128xf32>
    %4 = tpu.matmul %3, %0, %cst {dimension_numbers = #tpu.dot_dimension_numbers<[1], [0], [0], [1], [0, 0, 1, 1], [], []>} : vector<128x27xf32>, vector<27x128xf32>, vector<128x128xf32> -> vector<128x128xf32>
    %5 = vector.broadcast %1 : vector<1x128xf32> to vector<128x128xf32>
    %6 = arith.addf %4, %5 : vector<128x128xf32>
    %cst_6 = arith.constant 0.000000e+00 : f32
    %7 = vector.broadcast %cst_6 : f32 to vector<128x128xf32>
    %8 = arith.maximumf %6, %7 : vector<128x128xf32>
    %c1 = arith.constant 1 : index
    %c0_7 = arith.constant 0 : index
    %c0_8 = arith.constant 0 : index
    %9 = vector.load %arg1[%c1, %c0_7, %c0_8] : memref<4x128x27xf32, #tpu.memory_space<vmem>>, vector<1x128x27xf32>
    %10 = vector.shape_cast %9 : vector<1x128x27xf32> to vector<128x27xf32>
    %cst_9 = arith.constant dense<0.000000e+00> : vector<128x128xf32>
    %11 = tpu.matmul %10, %0, %cst_9 {dimension_numbers = #tpu.dot_dimension_numbers<[1], [0], [0], [1], [0, 0, 1, 1], [], []>} : vector<128x27xf32>, vector<27x128xf32>, vector<128x128xf32> -> vector<128x128xf32>
    %12 = vector.broadcast %1 : vector<1x128xf32> to vector<128x128xf32>
    %13 = arith.addf %11, %12 : vector<128x128xf32>
    %cst_10 = arith.constant 0.000000e+00 : f32
    %14 = vector.broadcast %cst_10 : f32 to vector<128x128xf32>
    %15 = arith.maximumf %13, %14 : vector<128x128xf32>
    %16 = arith.maximumf %8, %15 : vector<128x128xf32>
    %c2 = arith.constant 2 : index
    %c0_11 = arith.constant 0 : index
    %c0_12 = arith.constant 0 : index
    %17 = vector.load %arg1[%c2, %c0_11, %c0_12] : memref<4x128x27xf32, #tpu.memory_space<vmem>>, vector<1x128x27xf32>
    %18 = vector.shape_cast %17 : vector<1x128x27xf32> to vector<128x27xf32>
    %cst_13 = arith.constant dense<0.000000e+00> : vector<128x128xf32>
    %19 = tpu.matmul %18, %0, %cst_13 {dimension_numbers = #tpu.dot_dimension_numbers<[1], [0], [0], [1], [0, 0, 1, 1], [], []>} : vector<128x27xf32>, vector<27x128xf32>, vector<128x128xf32> -> vector<128x128xf32>
    %20 = vector.broadcast %1 : vector<1x128xf32> to vector<128x128xf32>
    %21 = arith.addf %19, %20 : vector<128x128xf32>
    %cst_14 = arith.constant 0.000000e+00 : f32
    %22 = vector.broadcast %cst_14 : f32 to vector<128x128xf32>
    %23 = arith.maximumf %21, %22 : vector<128x128xf32>
    %24 = arith.maximumf %16, %23 : vector<128x128xf32>
    %c3 = arith.constant 3 : index
    %c0_15 = arith.constant 0 : index
    %c0_16 = arith.constant 0 : index
    %25 = vector.load %arg1[%c3, %c0_15, %c0_16] : memref<4x128x27xf32, #tpu.memory_space<vmem>>, vector<1x128x27xf32>
    %26 = vector.shape_cast %25 : vector<1x128x27xf32> to vector<128x27xf32>
    %cst_17 = arith.constant dense<0.000000e+00> : vector<128x128xf32>
    %27 = tpu.matmul %26, %0, %cst_17 {dimension_numbers = #tpu.dot_dimension_numbers<[1], [0], [0], [1], [0, 0, 1, 1], [], []>} : vector<128x27xf32>, vector<27x128xf32>, vector<128x128xf32> -> vector<128x128xf32>
    %28 = vector.broadcast %1 : vector<1x128xf32> to vector<128x128xf32>
    %29 = arith.addf %27, %28 : vector<128x128xf32>
    %cst_18 = arith.constant 0.000000e+00 : f32
    %30 = vector.broadcast %cst_18 : f32 to vector<128x128xf32>
    %31 = arith.maximumf %29, %30 : vector<128x128xf32>
    %32 = arith.maximumf %24, %31 : vector<128x128xf32>
    %c0_19 = arith.constant 0 : index
    %c0_20 = arith.constant 0 : index
    %33 = vector.load %arg4[%c0_19, %c0_20] : memref<128x128xf32, #tpu.memory_space<vmem>>, vector<128x128xf32>
    tpu.vector_store %arg4[%c0_19, %c0_20], %32 {strides = array<i32>} : memref<128x128xf32, #tpu.memory_space<vmem>>, vector<128x128xf32>,
    return
  }
  func.func @transform_0(%arg0: i32) -> (i32, i32, i32) {
    %c0_i32 = arith.constant 0 : i32
    %c0_i32_0 = arith.constant 0 : i32
    %c0_i32_1 = arith.constant 0 : i32
    return %c0_i32, %arg0, %c0_i32_0 : i32, i32, i32
  }
  func.func @transform_1(%arg0: i32) -> (i32, i32) {
    %c0_i32 = arith.constant 0 : i32
    %c0_i32_0 = arith.constant 0 : i32
    %c0_i32_1 = arith.constant 0 : i32
    return %c0_i32, %c0_i32_0 : i32, i32
  }
  func.func @transform_2(%arg0: i32) -> (i32, i32) {
    %c0_i32 = arith.constant 0 : i32
    %c0_i32_0 = arith.constant 0 : i32
    %c0_i32_1 = arith.constant 0 : i32
    return %c0_i32, %c0_i32_0 : i32, i32
  }
  func.func @transform_3(%arg0: i32) -> (i32, i32) {
    %c0_i32 = arith.constant 0 : i32
    %c0_i32_0 = arith.constant 0 : i32
    return %arg0, %c0_i32 : i32, i32
  }
}

module attributes {stable_mosaic.version = 11 : i64} {
  func.func @_conv_taps_kernel(%arg0: i32, %arg1: memref<4x32x72xf32, #tpu.memory_space<vmem>>, %arg2: memref<72x128xf32, #tpu.memory_space<vmem>>, %arg3: memref<1x128xf32, #tpu.memory_space<vmem>>, %arg4: memref<32x128xf32, #tpu.memory_space<vmem>>) attributes {dimension_semantics = [#tpu.dimension_semantics<parallel>], iteration_bounds = array<i64: 1>, scalar_prefetch = 0 : i64, scratch_operands = 0 : i64, tpu.core_type = #tpu.core_type<tc>, window_params = [{transform_indices = @transform_0, window_bounds = array<i64: 4, 32, 72>}, {pipeline_mode = #tpu.pipeline_mode<synchronous>, transform_indices = @transform_1, window_bounds = array<i64: 72, 128>}, {pipeline_mode = #tpu.pipeline_mode<synchronous>, transform_indices = @transform_2, window_bounds = array<i64: 1, 128>}, {transform_indices = @transform_3, window_bounds = array<i64: 32, 128>}]} {
    %c0 = arith.constant 0 : index
    %c0_0 = arith.constant 0 : index
    %0 = vector.load %arg2[%c0, %c0_0] : memref<72x128xf32, #tpu.memory_space<vmem>>, vector<72x128xf32>
    %c0_1 = arith.constant 0 : index
    %c0_2 = arith.constant 0 : index
    %1 = vector.load %arg3[%c0_1, %c0_2] : memref<1x128xf32, #tpu.memory_space<vmem>>, vector<1x128xf32>
    %c0_3 = arith.constant 0 : index
    %c0_4 = arith.constant 0 : index
    %c0_5 = arith.constant 0 : index
    %2 = vector.load %arg1[%c0_3, %c0_4, %c0_5] : memref<4x32x72xf32, #tpu.memory_space<vmem>>, vector<1x32x72xf32>
    %3 = vector.shape_cast %2 : vector<1x32x72xf32> to vector<32x72xf32>
    %cst = arith.constant dense<0.000000e+00> : vector<32x128xf32>
    %4 = tpu.matmul %3, %0, %cst {dimension_numbers = #tpu.dot_dimension_numbers<[1], [0], [0], [1], [0, 0, 1, 1], [], []>} : vector<32x72xf32>, vector<72x128xf32>, vector<32x128xf32> -> vector<32x128xf32>
    %5 = vector.broadcast %1 : vector<1x128xf32> to vector<32x128xf32>
    %6 = arith.addf %4, %5 : vector<32x128xf32>
    %cst_6 = arith.constant 0.000000e+00 : f32
    %7 = vector.broadcast %cst_6 : f32 to vector<32x128xf32>
    %8 = arith.maximumf %6, %7 : vector<32x128xf32>
    %c1 = arith.constant 1 : index
    %c0_7 = arith.constant 0 : index
    %c0_8 = arith.constant 0 : index
    %9 = vector.load %arg1[%c1, %c0_7, %c0_8] : memref<4x32x72xf32, #tpu.memory_space<vmem>>, vector<1x32x72xf32>
    %10 = vector.shape_cast %9 : vector<1x32x72xf32> to vector<32x72xf32>
    %cst_9 = arith.constant dense<0.000000e+00> : vector<32x128xf32>
    %11 = tpu.matmul %10, %0, %cst_9 {dimension_numbers = #tpu.dot_dimension_numbers<[1], [0], [0], [1], [0, 0, 1, 1], [], []>} : vector<32x72xf32>, vector<72x128xf32>, vector<32x128xf32> -> vector<32x128xf32>
    %12 = vector.broadcast %1 : vector<1x128xf32> to vector<32x128xf32>
    %13 = arith.addf %11, %12 : vector<32x128xf32>
    %cst_10 = arith.constant 0.000000e+00 : f32
    %14 = vector.broadcast %cst_10 : f32 to vector<32x128xf32>
    %15 = arith.maximumf %13, %14 : vector<32x128xf32>
    %16 = arith.maximumf %8, %15 : vector<32x128xf32>
    %c2 = arith.constant 2 : index
    %c0_11 = arith.constant 0 : index
    %c0_12 = arith.constant 0 : index
    %17 = vector.load %arg1[%c2, %c0_11, %c0_12] : memref<4x32x72xf32, #tpu.memory_space<vmem>>, vector<1x32x72xf32>
    %18 = vector.shape_cast %17 : vector<1x32x72xf32> to vector<32x72xf32>
    %cst_13 = arith.constant dense<0.000000e+00> : vector<32x128xf32>
    %19 = tpu.matmul %18, %0, %cst_13 {dimension_numbers = #tpu.dot_dimension_numbers<[1], [0], [0], [1], [0, 0, 1, 1], [], []>} : vector<32x72xf32>, vector<72x128xf32>, vector<32x128xf32> -> vector<32x128xf32>
    %20 = vector.broadcast %1 : vector<1x128xf32> to vector<32x128xf32>
    %21 = arith.addf %19, %20 : vector<32x128xf32>
    %cst_14 = arith.constant 0.000000e+00 : f32
    %22 = vector.broadcast %cst_14 : f32 to vector<32x128xf32>
    %23 = arith.maximumf %21, %22 : vector<32x128xf32>
    %24 = arith.maximumf %16, %23 : vector<32x128xf32>
    %c3 = arith.constant 3 : index
    %c0_15 = arith.constant 0 : index
    %c0_16 = arith.constant 0 : index
    %25 = vector.load %arg1[%c3, %c0_15, %c0_16] : memref<4x32x72xf32, #tpu.memory_space<vmem>>, vector<1x32x72xf32>
    %26 = vector.shape_cast %25 : vector<1x32x72xf32> to vector<32x72xf32>
    %cst_17 = arith.constant dense<0.000000e+00> : vector<32x128xf32>
    %27 = tpu.matmul %26, %0, %cst_17 {dimension_numbers = #tpu.dot_dimension_numbers<[1], [0], [0], [1], [0, 0, 1, 1], [], []>} : vector<32x72xf32>, vector<72x128xf32>, vector<32x128xf32> -> vector<32x128xf32>
    %28 = vector.broadcast %1 : vector<1x128xf32> to vector<32x128xf32>
    %29 = arith.addf %27, %28 : vector<32x128xf32>
    %cst_18 = arith.constant 0.000000e+00 : f32
    %30 = vector.broadcast %cst_18 : f32 to vector<32x128xf32>
    %31 = arith.maximumf %29, %30 : vector<32x128xf32>
    %32 = arith.maximumf %24, %31 : vector<32x128xf32>
    %c0_19 = arith.constant 0 : index
    %c0_20 = arith.constant 0 : index
    %33 = vector.load %arg4[%c0_19, %c0_20] : memref<32x128xf32, #tpu.memory_space<vmem>>, vector<32x128xf32>
    tpu.vector_store %arg4[%c0_19, %c0_20], %32 {strides = array<i32>} : memref<32x128xf32, #tpu.memory_space<vmem>>, vector<32x128xf32>,
    return
  }
  func.func @transform_0(%arg0: i32) -> (i32, i32, i32) {
    %c0_i32 = arith.constant 0 : i32
    %c0_i32_0 = arith.constant 0 : i32
    %c0_i32_1 = arith.constant 0 : i32
    return %c0_i32, %arg0, %c0_i32_0 : i32, i32, i32
  }
  func.func @transform_1(%arg0: i32) -> (i32, i32) {
    %c0_i32 = arith.constant 0 : i32
    %c0_i32_0 = arith.constant 0 : i32
    %c0_i32_1 = arith.constant 0 : i32
    return %c0_i32, %c0_i32_0 : i32, i32
  }
  func.func @transform_2(%arg0: i32) -> (i32, i32) {
    %c0_i32 = arith.constant 0 : i32
    %c0_i32_0 = arith.constant 0 : i32
    %c0_i32_1 = arith.constant 0 : i32
    return %c0_i32, %c0_i32_0 : i32, i32
  }
  func.func @transform_3(%arg0: i32) -> (i32, i32) {
    %c0_i32 = arith.constant 0 : i32
    %c0_i32_0 = arith.constant 0 : i32
    return %arg0, %c0_i32 : i32, i32
  }
}

module attributes {stable_mosaic.version = 11 : i64} {
  func.func @_conv_taps_kernel(%arg0: i32, %arg1: memref<4x8x144xf32, #tpu.memory_space<vmem>>, %arg2: memref<144x128xf32, #tpu.memory_space<vmem>>, %arg3: memref<1x128xf32, #tpu.memory_space<vmem>>, %arg4: memref<8x128xf32, #tpu.memory_space<vmem>>) attributes {dimension_semantics = [#tpu.dimension_semantics<parallel>], iteration_bounds = array<i64: 1>, scalar_prefetch = 0 : i64, scratch_operands = 0 : i64, tpu.core_type = #tpu.core_type<tc>, window_params = [{transform_indices = @transform_0, window_bounds = array<i64: 4, 8, 144>}, {pipeline_mode = #tpu.pipeline_mode<synchronous>, transform_indices = @transform_1, window_bounds = array<i64: 144, 128>}, {pipeline_mode = #tpu.pipeline_mode<synchronous>, transform_indices = @transform_2, window_bounds = array<i64: 1, 128>}, {transform_indices = @transform_3, window_bounds = array<i64: 8, 128>}]} {
    %c0 = arith.constant 0 : index
    %c0_0 = arith.constant 0 : index
    %0 = vector.load %arg2[%c0, %c0_0] : memref<144x128xf32, #tpu.memory_space<vmem>>, vector<144x128xf32>
    %c0_1 = arith.constant 0 : index
    %c0_2 = arith.constant 0 : index
    %1 = vector.load %arg3[%c0_1, %c0_2] : memref<1x128xf32, #tpu.memory_space<vmem>>, vector<1x128xf32>
    %c0_3 = arith.constant 0 : index
    %c0_4 = arith.constant 0 : index
    %c0_5 = arith.constant 0 : index
    %2 = vector.load %arg1[%c0_3, %c0_4, %c0_5] : memref<4x8x144xf32, #tpu.memory_space<vmem>>, vector<1x8x144xf32>
    %3 = vector.shape_cast %2 : vector<1x8x144xf32> to vector<8x144xf32>
    %cst = arith.constant dense<0.000000e+00> : vector<8x128xf32>
    %4 = tpu.matmul %3, %0, %cst {dimension_numbers = #tpu.dot_dimension_numbers<[1], [0], [0], [1], [0, 0, 1, 1], [], []>} : vector<8x144xf32>, vector<144x128xf32>, vector<8x128xf32> -> vector<8x128xf32>
    %5 = vector.broadcast %1 : vector<1x128xf32> to vector<8x128xf32>
    %6 = arith.addf %4, %5 : vector<8x128xf32>
    %cst_6 = arith.constant 0.000000e+00 : f32
    %7 = vector.broadcast %cst_6 : f32 to vector<8x128xf32>
    %8 = arith.maximumf %6, %7 : vector<8x128xf32>
    %c1 = arith.constant 1 : index
    %c0_7 = arith.constant 0 : index
    %c0_8 = arith.constant 0 : index
    %9 = vector.load %arg1[%c1, %c0_7, %c0_8] : memref<4x8x144xf32, #tpu.memory_space<vmem>>, vector<1x8x144xf32>
    %10 = vector.shape_cast %9 : vector<1x8x144xf32> to vector<8x144xf32>
    %cst_9 = arith.constant dense<0.000000e+00> : vector<8x128xf32>
    %11 = tpu.matmul %10, %0, %cst_9 {dimension_numbers = #tpu.dot_dimension_numbers<[1], [0], [0], [1], [0, 0, 1, 1], [], []>} : vector<8x144xf32>, vector<144x128xf32>, vector<8x128xf32> -> vector<8x128xf32>
    %12 = vector.broadcast %1 : vector<1x128xf32> to vector<8x128xf32>
    %13 = arith.addf %11, %12 : vector<8x128xf32>
    %cst_10 = arith.constant 0.000000e+00 : f32
    %14 = vector.broadcast %cst_10 : f32 to vector<8x128xf32>
    %15 = arith.maximumf %13, %14 : vector<8x128xf32>
    %16 = arith.maximumf %8, %15 : vector<8x128xf32>
    %c2 = arith.constant 2 : index
    %c0_11 = arith.constant 0 : index
    %c0_12 = arith.constant 0 : index
    %17 = vector.load %arg1[%c2, %c0_11, %c0_12] : memref<4x8x144xf32, #tpu.memory_space<vmem>>, vector<1x8x144xf32>
    %18 = vector.shape_cast %17 : vector<1x8x144xf32> to vector<8x144xf32>
    %cst_13 = arith.constant dense<0.000000e+00> : vector<8x128xf32>
    %19 = tpu.matmul %18, %0, %cst_13 {dimension_numbers = #tpu.dot_dimension_numbers<[1], [0], [0], [1], [0, 0, 1, 1], [], []>} : vector<8x144xf32>, vector<144x128xf32>, vector<8x128xf32> -> vector<8x128xf32>
    %20 = vector.broadcast %1 : vector<1x128xf32> to vector<8x128xf32>
    %21 = arith.addf %19, %20 : vector<8x128xf32>
    %cst_14 = arith.constant 0.000000e+00 : f32
    %22 = vector.broadcast %cst_14 : f32 to vector<8x128xf32>
    %23 = arith.maximumf %21, %22 : vector<8x128xf32>
    %24 = arith.maximumf %16, %23 : vector<8x128xf32>
    %c3 = arith.constant 3 : index
    %c0_15 = arith.constant 0 : index
    %c0_16 = arith.constant 0 : index
    %25 = vector.load %arg1[%c3, %c0_15, %c0_16] : memref<4x8x144xf32, #tpu.memory_space<vmem>>, vector<1x8x144xf32>
    %26 = vector.shape_cast %25 : vector<1x8x144xf32> to vector<8x144xf32>
    %cst_17 = arith.constant dense<0.000000e+00> : vector<8x128xf32>
    %27 = tpu.matmul %26, %0, %cst_17 {dimension_numbers = #tpu.dot_dimension_numbers<[1], [0], [0], [1], [0, 0, 1, 1], [], []>} : vector<8x144xf32>, vector<144x128xf32>, vector<8x128xf32> -> vector<8x128xf32>
    %28 = vector.broadcast %1 : vector<1x128xf32> to vector<8x128xf32>
    %29 = arith.addf %27, %28 : vector<8x128xf32>
    %cst_18 = arith.constant 0.000000e+00 : f32
    %30 = vector.broadcast %cst_18 : f32 to vector<8x128xf32>
    %31 = arith.maximumf %29, %30 : vector<8x128xf32>
    %32 = arith.maximumf %24, %31 : vector<8x128xf32>
    %c0_19 = arith.constant 0 : index
    %c0_20 = arith.constant 0 : index
    %33 = vector.load %arg4[%c0_19, %c0_20] : memref<8x128xf32, #tpu.memory_space<vmem>>, vector<8x128xf32>
    tpu.vector_store %arg4[%c0_19, %c0_20], %32 {strides = array<i32>} : memref<8x128xf32, #tpu.memory_space<vmem>>, vector<8x128xf32>,
    return
  }
  func.func @transform_0(%arg0: i32) -> (i32, i32, i32) {
    %c0_i32 = arith.constant 0 : i32
    %c0_i32_0 = arith.constant 0 : i32
    %c0_i32_1 = arith.constant 0 : i32
    return %c0_i32, %arg0, %c0_i32_0 : i32, i32, i32
  }
  func.func @transform_1(%arg0: i32) -> (i32, i32) {
    %c0_i32 = arith.constant 0 : i32
    %c0_i32_0 = arith.constant 0 : i32
    %c0_i32_1 = arith.constant 0 : i32
    return %c0_i32, %c0_i32_0 : i32, i32
  }
  func.func @transform_2(%arg0: i32) -> (i32, i32) {
    %c0_i32 = arith.constant 0 : i32
    %c0_i32_0 = arith.constant 0 : i32
    %c0_i32_1 = arith.constant 0 : i32
    return %c0_i32, %c0_i32_0 : i32, i32
  }
  func.func @transform_3(%arg0: i32) -> (i32, i32) {
    %c0_i32 = arith.constant 0 : i32
    %c0_i32_0 = arith.constant 0 : i32
    return %arg0, %c0_i32 : i32, i32
  }
}

</mosaic_0001>

<bundles_post_ra>
// kernel: _lambda_.3
= control target key start
LH: loop header
LB: loop body
LE: loop exit
PB: predicated region body
PF: predicated region fallthrough
CT: control target
= control target key end

     0   :  { %vm90_vm0 = vcmask 1042432   ;;  %vm41_vm1 = vcmask 220160   ;;  %vm1367_vm2 = vmmov 1   ;;  %s1841_s1 = inlined_call_operand.vmem [shape: f32[27,128], index: 1, kind: input, shape index: {}]   ;;  %s1842_s0 = inlined_call_operand.vmem [shape: f32[4,128,27], index: 0, kind: input, shape index: {}]   ;;  %s1843_s2 = inlined_call_operand.vmem [shape: f32[1,128], index: 2, kind: input, shape index: {}]   ;;  %s1844_s3 = inlined_call_operand.vmem [shape: f32[128,128], index: 3, kind: output, shape index: {}]  }
   0x1   :  { %v14_v0 = vld [vmem:[%s1841_s1] sm:$0xff]  ;;  %v15_v1 = vld [vmem:[%s1841_s1 + $0x8] sm:$0xff]  ;;  %v16_v2 = vld [vmem:[%s1841_s1 + $0x10] sm:$0xff] }
   0x2   :  { %v1326_v3 = vpack.c.bf16 %v15_v1, %v14_v0  ;;  %v17_v4 = vld [vmem:[%s1841_s1 + $0x18] sm:$0x7]  ;;  %v19_v5 = vld [vmem:[%s1842_s0] sm:$0xff]  ;;  %vm1403_vm3 = vmpackc.low %vm90_vm0, %vm1367_vm2 }
   0x3   :  { %v1330_v6 = vpack.c.bf16 %v17_v4, %v16_v2  ;;  %1206 = vmatprep.mubr.msk.f32.mxu0 %vm41_vm1, %v19_v5  ;;  %v1019_v8 = vld [vmem:[%s1842_s0 + $0x80] sm:$0xff]  ;;  %v20_v9 = vld [vmem:[%s1842_s0 + $0x8] sm:$0xff]  ;;  %v21_v11 = vld [vmem:[%s1842_s0 + $0x10] sm:$0xff] }
   0x4   :  { %1327 = vmatprep.subr.bf16.mxu0 %v1326_v3  ;;  %1337 = vmatprep.subr.bf16.mxu1 %v1326_v3  ;;  %v1020_v10 = vld [vmem:[%s1842_s0 + $0x88] sm:$0xff]  ;;  %v1021_v12 = vld [vmem:[%s1842_s0 + $0x90] sm:$0xff]  ;;  %v22_v13 = vld [vmem:[%s1842_s0 + $0x18] sm:$0xff] }
   0x5   :  { %1329 = vmatpush3.bf16.msra.mxu0 %v1326_v3  ;;  %1339 = vmatpush3.bf16.msra.mxu1 %v1326_v3  ;;  %v1022_v14 = vld [vmem:[%s1842_s0 + $0x98] sm:$0xff]  ;;  %v23_v15 = vld [vmem:[%s1842_s0 + $0x20] sm:$0xff]  ;;  %v24_v17 = vld [vmem:[%s1842_s0 + $0x28] sm:$0xff] }
   0x6   :  { %1332 = vmatprep.subr.msk.bf16.mxu0 %vm1403_vm3, %v1330_v6  ;;  %1342 = vmatprep.subr.msk.bf16.mxu1 %vm1403_vm3, %v1330_v6  ;;  %v1023_v16 = vld [vmem:[%s1842_s0 + $0xa0] sm:$0xff]  ;;  %v1024_v18 = vld [vmem:[%s1842_s0 + $0xa8] sm:$0xff]  ;;  %v25_v19 = vld [vmem:[%s1842_s0 + $0x30] sm:$0xff] }
   0x7   :  { %1238 = vmatprep.mubr.msk.f32.mxu1 %vm41_vm1, %v1019_v8  ;;  %v1025_v20 = vld [vmem:[%s1842_s0 + $0xb0] sm:$0xff]  ;;  %v26_v21 = vld [vmem:[%s1842_s0 + $0x38] sm:$0xff]  ;;  %v27_v23 = vld [vmem:[%s1842_s0 + $0x40] sm:$0xff] }
   0x8   :  { %v1026_v22 = vld [vmem:[%s1842_s0 + $0xb8] sm:$0xff]  ;;  %v1027_v24 = vld [vmem:[%s1842_s0 + $0xc0] sm:$0xff]  ;;  %v28_v25 = vld [vmem:[%s1842_s0 + $0x48] sm:$0xff] }
   0x9   :  { %1335 = vmatpush3.bf16.msk.msra.mxu0 %vm1403_vm3, %v1330_v6  ;;  %1345 = vmatpush3.bf16.msk.msra.mxu1 %vm1403_vm3, %v1330_v6  ;;  %v1028_v26 = vld [vmem:[%s1842_s0 + $0xc8] sm:$0xff]  ;;  %v29_v27 = vld [vmem:[%s1842_s0 + $0x50] sm:$0xff]  ;;  %v30_v29 = vld [vmem:[%s1842_s0 + $0x58] sm:$0xff] }
   0xa   :  { %1347 = vmatprep.subr.bf16.mxu0 %v1326_v3  ;;  %1357 = vmatprep.subr.bf16.mxu1 %v1326_v3  ;;  %v1029_v28 = vld [vmem:[%s1842_s0 + $0xd0] sm:$0xff]  ;;  %v1030_v30 = vld [vmem:[%s1842_s0 + $0xd8] sm:$0xff]  ;;  %v31_v31 = vld [vmem:[%s1842_s0 + $0x60] sm:$0xff] }
   0xb   :  { %v1031_v32 = vld [vmem:[%s1842_s0 + $0xe0] sm:$0xff]  ;;  %v32_v33 = vld [vmem:[%s1842_s0 + $0x68] sm:$0xff]  ;;  %v33_v35 = vld [vmem:[%s1842_s0 + $0x70] sm:$0xff] }
   0xc   :  { %1207 = vmatmul.mubr.msk.f32.vlgmr.msra.gmra.mrb[0].mxu0 %vm41_vm1, %v20_v9  ;;  %1239 = vmatmul.mubr.msk.f32.vlgmr.msra.gmra.mrb[0].mxu1 %vm41_vm1, %v1020_v10  ;;  %v1032_v34 = vld [vmem:[%s1842_s0 + $0xe8] sm:$0xff]  ;;  %v1033_v36 = vld [vmem:[%s1842_s0 + $0xf0] sm:$0xff]  ;;  %v34_v37 = vld [vmem:[%s1842_s0 + $0x78] sm:$0xff] }
   0xd   :  { %1349 = vmatpush3.bf16.msra.mxu0 %v1326_v3  ;;  %1209 = vmatprep.mubr.msk.f32.mxu0 %vm41_vm1, %v21_v11  ;;  %v1034_v38 = vld [vmem:[%s1842_s0 + $0xf8] sm:$0xff]  ;;  %v1052_v39 = vld [vmem:[%s1842_s0 + $0x100] sm:$0xff]  ;;  %v1053_v41 = vld [vmem:[%s1842_s0 + $0x108] sm:$0xff] }
   0xe   :  { %1241 = vmatprep.mubr.msk.f32.mxu1 %vm41_vm1, %v1021_v12  ;;  %1359 = vmatpush3.bf16.msra.mxu1 %v1326_v3  ;;  %v1085_v40 = vld [vmem:[%s1842_s0 + $0x180] sm:$0xff]  ;;  %v1086_v42 = vld [vmem:[%s1842_s0 + $0x188] sm:$0xff]  ;;  %v1054_v43 = vld [vmem:[%s1842_s0 + $0x110] sm:$0xff] }
   0xf   :  { %1352 = vmatprep.subr.msk.bf16.mxu0 %vm1403_vm3, %v1330_v6  ;;  %1362 = vmatprep.subr.msk.bf16.mxu1 %vm1403_vm3, %v1330_v6  ;;  %v1087_v44 = vld [vmem:[%s1842_s0 + $0x190] sm:$0xff]  ;;  %v1055_v45 = vld [vmem:[%s1842_s0 + $0x118] sm:$0xff]  ;;  %v1056_v47 = vld [vmem:[%s1842_s0 + $0x120] sm:$0xff] }
  0x10   :  { %1210 = vmatmul.mubr.msk.f32.gmra.mrb[2].mxu0 %vm41_vm1, %v22_v13  ;;  %1242 = vmatmul.mubr.msk.f32.gmra.mrb[2].mxu1 %vm41_vm1, %v1022_v14  ;;  %v1088_v46 = vld [vmem:[%s1842_s0 + $0x198] sm:$0xff]  ;;  %v1089_v48 = vld [vmem:[%s1842_s0 + $0x1a0] sm:$0xff]  ;;  %v1057_v49 = vld [vmem:[%s1842_s0 + $0x128] sm:$0xff] }
  0x11   :  { %1212 = vmatprep.mubr.msk.f32.mxu0 %vm41_vm1, %v23_v15  ;;  %1244 = vmatprep.mubr.msk.f32.mxu1 %vm41_vm1, %v1023_v16  ;;  %v1090_v50 = vld [vmem:[%s1842_s0 + $0x1a8] sm:$0xff]  ;;  %v1058_v51 = vld [vmem:[%s1842_s0 + $0x130] sm:$0xff]  ;;  %v1059_v53 = vld [vmem:[%s1842_s0 + $0x138] sm:$0xff] }
  0x12   :  { %1355 = vmatpush3.bf16.msk.msra.mxu0 %vm1403_vm3, %v1330_v6  ;;  %1365 = vmatpush3.bf16.msk.msra.mxu1 %vm1403_vm3, %v1330_v6  ;;  %v1091_v52 = vld [vmem:[%s1842_s0 + $0x1b0] sm:$0xff]  ;;  %v1092_v54 = vld [vmem:[%s1842_s0 + $0x1b8] sm:$0xff]  ;;  %v1060_v55 = vld [vmem:[%s1842_s0 + $0x140] sm:$0xff] }
  0x13   :  { %v1093_v56 = vld [vmem:[%s1842_s0 + $0x1c0] sm:$0xff]  ;;  %v1061_v57 = vld [vmem:[%s1842_s0 + $0x148] sm:$0xff]  ;;  %v1062_v59 = vld [vmem:[%s1842_s0 + $0x150] sm:$0xff] }
  0x14   :  { %1213 = vmatmul.mubr.msk.f32.gmra.mrb[4].mxu0 %vm41_vm1, %v24_v17  ;;  %1245 = vmatmul.mubr.msk.f32.gmra.mrb[4].mxu1 %vm41_vm1, %v1024_v18  ;;  %v1094_v58 = vld [vmem:[%s1842_s0 + $0x1c8] sm:$0xff]  ;;  %v1095_v60 = vld [vmem:[%s1842_s0 + $0x1d0] sm:$0xff]  ;;  %v1063_v61 = vld [vmem:[%s1842_s0 + $0x158] sm:$0xff] }
  0x15   :  { %1215 = vmatprep.mubr.msk.f32.mxu0 %vm41_vm1, %v25_v19  ;;  %1247 = vmatprep.mubr.msk.f32.mxu1 %vm41_vm1, %v1025_v20  ;;  %v1096_v62 = vld [vmem:[%s1842_s0 + $0x1d8] sm:$0xff]  ;;  %v1064_v63 = vld [vmem:[%s1842_s0 + $0x160] sm:$0xff]  ;;  %v1065_v1 = vld [vmem:[%s1842_s0 + $0x168] sm:$0xff] }
  0x16   :  { %v1097_v0 = vld [vmem:[%s1842_s0 + $0x1e0] sm:$0xff]  ;;  %v1098_v2 = vld [vmem:[%s1842_s0 + $0x1e8] sm:$0xff]  ;;  %v1066_v3 = vld [vmem:[%s1842_s0 + $0x170] sm:$0xff] }
  0x17   :  { %v1099_v4 = vld [vmem:[%s1842_s0 + $0x1f0] sm:$0xff]  ;;  %v1067_v5 = vld [vmem:[%s1842_s0 + $0x178] sm:$0xff]  ;;  %v1679_v7 = vld [vmem:[%s1843_s2] ss:$0 sm:$0xff] }
  0x18   :  { %1216 = vmatmul.mubr.msk.f32.gmra.mrb[6].mxu0 %vm41_vm1, %v26_v21  ;;  %1248 = vmatmul.mubr.msk.f32.gmra.mrb[6].mxu1 %vm41_vm1, %v1026_v22  ;;  %v1100_v6 = vld [vmem:[%s1842_s0 + $0x1f8] sm:$0xff] }
  0x19   :  { %1218 = vmatprep.mubr.msk.f32.mxu0 %vm41_vm1, %v27_v23  ;;  %1250 = vmatprep.mubr.msk.f32.mxu1 %vm41_vm1, %v1027_v24 }
  0x1c   :  { %1219 = vmatmul.mubr.msk.f32.gmra.mrb[8].mxu0 %vm41_vm1, %v28_v25  ;;  %1251 = vmatmul.mubr.msk.f32.gmra.mrb[8].mxu1 %vm41_vm1, %v1028_v26 }
  0x1d   :  { %1221 = vmatprep.mubr.msk.f32.mxu0 %vm41_vm1, %v29_v27  ;;  %1253 = vmatprep.mubr.msk.f32.mxu1 %vm41_vm1, %v1029_v28 }
  0x20   :  { %1222 = vmatmul.mubr.msk.f32.gmra.mrb[10].mxu0 %vm41_vm1, %v30_v29  ;;  %1254 = vmatmul.mubr.msk.f32.gmra.mrb[10].mxu1 %vm41_vm1, %v1030_v30 }
  0x21   :  { %1224 = vmatprep.mubr.msk.f32.mxu0 %vm41_vm1, %v31_v31  ;;  %1256 = vmatprep.mubr.msk.f32.mxu1 %vm41_vm1, %v1031_v32 }
  0x24   :  { %1225 = vmatmul.mubr.msk.f32.gmra.mrb[12].mxu0 %vm41_vm1, %v32_v33  ;;  %1257 = vmatmul.mubr.msk.f32.gmra.mrb[12].mxu1 %vm41_vm1, %v1032_v34 }
  0x25   :  { %1227 = vmatprep.mubr.msk.f32.mxu0 %vm41_vm1, %v33_v35  ;;  %1259 = vmatprep.mubr.msk.f32.mxu1 %vm41_vm1, %v1033_v36 }
  0x28   :  { %1228 = vmatmul.mubr.msk.f32.gmra.mrb[14].mxu0 %vm41_vm1, %v34_v37  ;;  %1260 = vmatmul.mubr.msk.f32.gmra.mrb[14].mxu1 %vm41_vm1, %v1034_v38 }
  0x29   :  { %1270 = vmatprep.mubr.msk.f32.mxu0 %vm41_vm1, %v1052_v39  ;;  %1302 = vmatprep.mubr.msk.f32.mxu1 %vm41_vm1, %v1085_v40 }
  0x2c   :  { %1271 = vmatmul.mubr.msk.f32.vlgmr.msra.gmra.mrb[16].mxu0 %vm41_vm1, %v1053_v41  ;;  %1303 = vmatmul.mubr.msk.f32.vlgmr.msra.gmra.mrb[16].mxu1 %vm41_vm1, %v1086_v42 }
  0x2d   :  { %1273 = vmatprep.mubr.msk.f32.mxu0 %vm41_vm1, %v1054_v43  ;;  %1305 = vmatprep.mubr.msk.f32.mxu1 %vm41_vm1, %v1087_v44 }
  0x30   :  { %1274 = vmatmul.mubr.msk.f32.gmra.mrb[18].mxu0 %vm41_vm1, %v1055_v45  ;;  %1306 = vmatmul.mubr.msk.f32.gmra.mrb[18].mxu1 %vm41_vm1, %v1088_v46 }
  0x31   :  { %1276 = vmatprep.mubr.msk.f32.mxu0 %vm41_vm1, %v1056_v47  ;;  %1308 = vmatprep.mubr.msk.f32.mxu1 %vm41_vm1, %v1089_v48 }
  0x34   :  { %1277 = vmatmul.mubr.msk.f32.gmra.mrb[20].mxu0 %vm41_vm1, %v1057_v49  ;;  %1309 = vmatmul.mubr.msk.f32.gmra.mrb[20].mxu1 %vm41_vm1, %v1090_v50 }
  0x35   :  { %1279 = vmatprep.mubr.msk.f32.mxu0 %vm41_vm1, %v1058_v51  ;;  %1311 = vmatprep.mubr.msk.f32.mxu1 %vm41_vm1, %v1091_v52 }
  0x38   :  { %1280 = vmatmul.mubr.msk.f32.gmra.mrb[22].mxu0 %vm41_vm1, %v1059_v53  ;;  %1312 = vmatmul.mubr.msk.f32.gmra.mrb[22].mxu1 %vm41_vm1, %v1092_v54 }
  0x39   :  { %1282 = vmatprep.mubr.msk.f32.mxu0 %vm41_vm1, %v1060_v55  ;;  %1314 = vmatprep.mubr.msk.f32.mxu1 %vm41_vm1, %v1093_v56 }
  0x3c   :  { %1283 = vmatmul.mubr.msk.f32.gmra.mrb[24].mxu0 %vm41_vm1, %v1061_v57  ;;  %1315 = vmatmul.mubr.msk.f32.gmra.mrb[24].mxu1 %vm41_vm1, %v1094_v58 }
  0x3d   :  { %1285 = vmatprep.mubr.msk.f32.mxu0 %vm41_vm1, %v1062_v59  ;;  %1317 = vmatprep.mubr.msk.f32.mxu1 %vm41_vm1, %v1095_v60 }
  0x40   :  { %1286 = vmatmul.mubr.msk.f32.gmra.mrb[26].mxu0 %vm41_vm1, %v1063_v61  ;;  %1318 = vmatmul.mubr.msk.f32.gmra.mrb[26].mxu1 %vm41_vm1, %v1096_v62 }
  0x41   :  { %1288 = vmatprep.mubr.msk.f32.mxu0 %vm41_vm1, %v1064_v63  ;;  %1320 = vmatprep.mubr.msk.f32.mxu1 %vm41_vm1, %v1097_v0 }
  0x44   :  { %1289 = vmatmul.mubr.msk.f32.gmra.mrb[28].mxu0 %vm41_vm1, %v1065_v1  ;;  %1321 = vmatmul.mubr.msk.f32.gmra.mrb[28].mxu1 %vm41_vm1, %v1098_v2 }
  0x45   :  { %1291 = vmatprep.mubr.msk.f32.mxu0 %vm41_vm1, %v1066_v3  ;;  %1323 = vmatprep.mubr.msk.f32.mxu1 %vm41_vm1, %v1099_v4 }
  0x48   :  { %1292 = vmatmul.mubr.msk.f32.gmra.mrb[30].mxu0 %vm41_vm1, %v1067_v5  ;;  %1324 = vmatmul.mubr.msk.f32.gmra.mrb[30].mxu1 %vm41_vm1, %v1100_v6 }
  0xdf   :  { %v1208_v8 = vpop.f32.mrb[0].mxu0  ;;  %v1240_v9 = vpop.f32.mrb[0].mxu1 }
  0xe0   :  { %v166_v10 = vadd.f32 %v1208_v8, %v1679_v7  ;;  %v392_v11 = vadd.f32 %v1240_v9, %v1679_v7  ;;  %v160_v12 = vpop.f32.mrb[1].mxu0  ;;  %v386_v13 = vpop.f32.mrb[1].mxu1 }
  0xe1   :  { %v161_v14 = vadd.f32 %v1679_v7, %v160_v12  ;;  %v387_v15 = vadd.f32 %v1679_v7, %v386_v13 }
  0xe2   :  { %v240_v16 = vmax.f32 %v166_v10, 0.0  ;;  %v466_v17 = vmax.f32 %v392_v11, 0.0 }
  0xe3   :  { %v239_v18 = vmax.f32 %v161_v14, 0.0  ;;  %v465_v19 = vmax.f32 %v387_v15, 0.0  ;;  %v1211_v20 = vpop.f32.mrb[2].mxu0  ;;  %v1243_v21 = vpop.f32.mrb[2].mxu1 }
  0xe4   :  { %v1685_v22 = vmax.f32 %v240_v16, %v466_v17  ;;  %v176_v23 = vadd.f32 %v1211_v20, %v1679_v7  ;;  %v402_v24 = vadd.f32 %v1243_v21, %v1679_v7  ;;  %v170_v25 = vpop.f32.mrb[3].mxu0  ;;  %v396_v26 = vpop.f32.mrb[3].mxu1 }
  0xe5   :  { %v1689_v27 = vmax.f32 %v239_v18, %v465_v19  ;;  %v171_v28 = vadd.f32 %v1679_v7, %v170_v25  ;;  %v397_v29 = vadd.f32 %v1679_v7, %v396_v26 }
  0xe6   :  { %v242_v30 = vmax.f32 %v176_v23, 0.0  ;;  %v468_v31 = vmax.f32 %v402_v24, 0.0 }
  0xe7   :  { %v241_v32 = vmax.f32 %v171_v28, 0.0  ;;  %v467_v33 = vmax.f32 %v397_v29, 0.0  ;;  %v1214_v34 = vpop.f32.mrb[4].mxu0  ;;  %v1246_v35 = vpop.f32.mrb[4].mxu1 }
  0xe8   :  { %v1693_v36 = vmax.f32 %v242_v30, %v468_v31  ;;  %v186_v37 = vadd.f32 %v1214_v34, %v1679_v7  ;;  %v412_v38 = vadd.f32 %v1246_v35, %v1679_v7  ;;  %v180_v39 = vpop.f32.mrb[5].mxu0  ;;  %v406_v40 = vpop.f32.mrb[5].mxu1 }
  0xe9   :  { %v1697_v41 = vmax.f32 %v241_v32, %v467_v33  ;;  %v181_v42 = vadd.f32 %v1679_v7, %v180_v39  ;;  %v407_v43 = vadd.f32 %v1679_v7, %v406_v40 }
  0xea   :  { %v244_v44 = vmax.f32 %v186_v37, 0.0  ;;  %v470_v45 = vmax.f32 %v412_v38, 0.0 }
  0xeb   :  { %v243_v46 = vmax.f32 %v181_v42, 0.0  ;;  %v469_v47 = vmax.f32 %v407_v43, 0.0  ;;  %v1217_v48 = vpop.f32.mrb[6].mxu0  ;;  %v1249_v49 = vpop.f32.mrb[6].mxu1 }
  0xec   :  { %v1701_v50 = vmax.f32 %v244_v44, %v470_v45  ;;  %v196_v51 = vadd.f32 %v1217_v48, %v1679_v7  ;;  %v422_v52 = vadd.f32 %v1249_v49, %v1679_v7  ;;  %v190_v53 = vpop.f32.mrb[7].mxu0  ;;  %v416_v54 = vpop.f32.mrb[7].mxu1 }
  0xed   :  { %v1705_v55 = vmax.f32 %v243_v46, %v469_v47  ;;  %v191_v56 = vadd.f32 %v1679_v7, %v190_v53  ;;  %v417_v57 = vadd.f32 %v1679_v7, %v416_v54 }
  0xee   :  { %v246_v58 = vmax.f32 %v196_v51, 0.0  ;;  %v472_v59 = vmax.f32 %v422_v52, 0.0 }
  0xef   :  { %v245_v60 = vmax.f32 %v191_v56, 0.0  ;;  %v471_v61 = vmax.f32 %v417_v57, 0.0  ;;  %v1220_v62 = vpop.f32.mrb[8].mxu0  ;;  %v1252_v63 = vpop.f32.mrb[8].mxu1 }
  0xf0   :  { %v1709_v0 = vmax.f32 %v246_v58, %v472_v59  ;;  %v206_v1 = vadd.f32 %v1220_v62, %v1679_v7  ;;  %v432_v2 = vadd.f32 %v1252_v63, %v1679_v7  ;;  %v200_v3 = vpop.f32.mrb[9].mxu0  ;;  %v426_v4 = vpop.f32.mrb[9].mxu1 }
  0xf1   :  { %v1713_v5 = vmax.f32 %v245_v60, %v471_v61  ;;  %v201_v6 = vadd.f32 %v1679_v7, %v200_v3  ;;  %v427_v8 = vadd.f32 %v1679_v7, %v426_v4 }
  0xf2   :  { %v248_v9 = vmax.f32 %v206_v1, 0.0  ;;  %v474_v10 = vmax.f32 %v432_v2, 0.0 }
  0xf3   :  { %v247_v11 = vmax.f32 %v201_v6, 0.0  ;;  %v473_v12 = vmax.f32 %v427_v8, 0.0  ;;  %v1223_v13 = vpop.f32.mrb[10].mxu0  ;;  %v1255_v14 = vpop.f32.mrb[10].mxu1 }
  0xf4   :  { %v1717_v15 = vmax.f32 %v248_v9, %v474_v10  ;;  %v216_v16 = vadd.f32 %v1223_v13, %v1679_v7  ;;  %v442_v17 = vadd.f32 %v1255_v14, %v1679_v7  ;;  %v210_v18 = vpop.f32.mrb[11].mxu0  ;;  %v436_v19 = vpop.f32.mrb[11].mxu1 }
  0xf5   :  { %v1721_v20 = vmax.f32 %v247_v11, %v473_v12  ;;  %v211_v21 = vadd.f32 %v1679_v7, %v210_v18  ;;  %v437_v23 = vadd.f32 %v1679_v7, %v436_v19 }
  0xf6   :  { %v250_v24 = vmax.f32 %v216_v16, 0.0  ;;  %v476_v25 = vmax.f32 %v442_v17, 0.0 }
  0xf7   :  { %v249_v26 = vmax.f32 %v211_v21, 0.0  ;;  %v475_v28 = vmax.f32 %v437_v23, 0.0  ;;  %v1226_v29 = vpop.f32.mrb[12].mxu0  ;;  %v1258_v30 = vpop.f32.mrb[12].mxu1 }
  0xf8   :  { %v1725_v31 = vmax.f32 %v250_v24, %v476_v25  ;;  %v226_v32 = vadd.f32 %v1226_v29, %v1679_v7  ;;  %v452_v33 = vadd.f32 %v1258_v30, %v1679_v7  ;;  %v220_v34 = vpop.f32.mrb[13].mxu0  ;;  %v446_v35 = vpop.f32.mrb[13].mxu1 }
  0xf9   :  { %v1729_v37 = vmax.f32 %v249_v26, %v475_v28  ;;  %v221_v38 = vadd.f32 %v1679_v7, %v220_v34  ;;  %v447_v39 = vadd.f32 %v1679_v7, %v446_v35 }
  0xfa   :  { %v252_v40 = vmax.f32 %v226_v32, 0.0  ;;  %v478_v42 = vmax.f32 %v452_v33, 0.0 }
  0xfb   :  { %v251_v43 = vmax.f32 %v221_v38, 0.0  ;;  %v477_v44 = vmax.f32 %v447_v39, 0.0  ;;  %v1229_v45 = vpop.f32.mrb[14].mxu0  ;;  %v1261_v46 = vpop.f32.mrb[14].mxu1 }
  0xfc   :  { %v1733_v47 = vmax.f32 %v252_v40, %v478_v42  ;;  %v236_v48 = vadd.f32 %v1229_v45, %v1679_v7  ;;  %v462_v49 = vadd.f32 %v1261_v46, %v1679_v7  ;;  %v230_v51 = vpop.f32.mrb[15].mxu0  ;;  %v456_v52 = vpop.f32.mrb[15].mxu1 }
  0xfd   :  { %v1737_v53 = vmax.f32 %v251_v43, %v477_v44  ;;  %v231_v54 = vadd.f32 %v1679_v7, %v230_v51  ;;  %v457_v56 = vadd.f32 %v1679_v7, %v456_v52 }
  0xfe   :  { %v254_v57 = vmax.f32 %v236_v48, 0.0  ;;  %v480_v58 = vmax.f32 %v462_v49, 0.0 }
  0xff   :  { %v253_v59 = vmax.f32 %v231_v54, 0.0  ;;  %v479_v60 = vmax.f32 %v457_v56, 0.0  ;;  %v1272_v61 = vpop.f32.mrb[16].mxu0  ;;  %v1304_v62 = vpop.f32.mrb[16].mxu1 }
 0x100   :  { %v1741_v63 = vmax.f32 %v254_v57, %v480_v58  ;;  %v634_v1 = vadd.f32 %v1272_v61, %v1679_v7  ;;  %v628_v2 = vpop.f32.mrb[17].mxu0  ;;  %v876_v3 = vadd.f32 %v1304_v62, %v1679_v7  ;;  %v870_v4 = vpop.f32.mrb[17].mxu1 }
 0x101   :  { %v1745_v6 = vmax.f32 %v253_v59, %v479_v60  ;;  %v629_v8 = vadd.f32 %v1679_v7, %v628_v2  ;;  %v871_v9 = vadd.f32 %v1679_v7, %v870_v4 }
 0x102   :  { %v708_v10 = vmax.f32 %v634_v1, 0.0  ;;  %v950_v11 = vmax.f32 %v876_v3, 0.0 }
 0x103   :  { %v707_v12 = vmax.f32 %v629_v8, 0.0  ;;  %v949_v13 = vmax.f32 %v871_v9, 0.0  ;;  %v1275_v14 = vpop.f32.mrb[18].mxu0  ;;  %v1307_v16 = vpop.f32.mrb[18].mxu1 }
 0x104   :  { %v724_v17 = vmax.f32 %v1685_v22, %v708_v10  ;;  %v644_v18 = vadd.f32 %v1275_v14, %v1679_v7  ;;  %v638_v19 = vpop.f32.mrb[19].mxu0  ;;  %v886_v21 = vadd.f32 %v1307_v16, %v1679_v7  ;;  %v880_v23 = vpop.f32.mrb[19].mxu1 }
 0x105   :  { %v723_v24 = vmax.f32 %v1689_v27, %v707_v12  ;;  %v639_v25 = vadd.f32 %v1679_v7, %v638_v19  ;;  %v881_v26 = vadd.f32 %v1679_v7, %v880_v23 }
 0x106   :  { %v966_v28 = vmax.f32 %v724_v17, %v950_v11  ;;  %v710_v29 = vmax.f32 %v644_v18, 0.0  ;;  %v952_v30 = vmax.f32 %v886_v21, 0.0 }
 0x107   :  { %v965_v32 = vmax.f32 %v723_v24, %v949_v13  ;;  %v709_v33 = vmax.f32 %v639_v25, 0.0  ;;  %v951_v34 = vmax.f32 %v881_v26, 0.0  ;;  %v1278_v35 = vpop.f32.mrb[20].mxu0  ;;  %v1310_v22 = vpop.f32.mrb[20].mxu1 }
 0x108   :  { %982 = vst [vmem:[%s1844_s3 + $0x8] sm:$0xff] %v966_v28  ;;  %v726_v38 = vmax.f32 %v1693_v36, %v710_v29  ;;  %v654_v27 = vadd.f32 %v1278_v35, %v1679_v7  ;;  %v648_v39 = vpop.f32.mrb[21].mxu0  ;;  %v896_v40 = vadd.f32 %v1310_v22, %v1679_v7  ;;  %v890_v42 = vpop.f32.mrb[21].mxu1 }
 0x109   :  { %981 = vst [vmem:[%s1844_s3] sm:$0xff] %v965_v32  ;;  %v725_v43 = vmax.f32 %v1697_v41, %v709_v33  ;;  %v649_v44 = vadd.f32 %v1679_v7, %v648_v39  ;;  %v891_v45 = vadd.f32 %v1679_v7, %v890_v42 }
 0x10a   :  { %v968_v46 = vmax.f32 %v726_v38, %v952_v30  ;;  %v712_v48 = vmax.f32 %v654_v27, 0.0  ;;  %v954_v49 = vmax.f32 %v896_v40, 0.0 }
 0x10b   :  { %v967_v36 = vmax.f32 %v725_v43, %v951_v34  ;;  %v711_v51 = vmax.f32 %v649_v44, 0.0  ;;  %v953_v52 = vmax.f32 %v891_v45, 0.0  ;;  %v1281_v54 = vpop.f32.mrb[22].mxu0  ;;  %v1313_v56 = vpop.f32.mrb[22].mxu1 }
 0x10c   :  { %984 = vst [vmem:[%s1844_s3 + $0x18] sm:$0xff] %v968_v46  ;;  %v728_v57 = vmax.f32 %v1701_v50, %v712_v48  ;;  %v664_v41 = vadd.f32 %v1281_v54, %v1679_v7  ;;  %v658_v58 = vpop.f32.mrb[23].mxu0  ;;  %v906_v59 = vadd.f32 %v1313_v56, %v1679_v7  ;;  %v900_v60 = vpop.f32.mrb[23].mxu1 }
 0x10d   :  { %983 = vst [vmem:[%s1844_s3 + $0x10] sm:$0xff] %v967_v36  ;;  %v727_v61 = vmax.f32 %v1705_v55, %v711_v51  ;;  %v659_v62 = vadd.f32 %v1679_v7, %v658_v58  ;;  %v901_v1 = vadd.f32 %v1679_v7, %v900_v60 }
 0x10e   :  { %v970_v2 = vmax.f32 %v728_v57, %v954_v49  ;;  %v714_v3 = vmax.f32 %v664_v41, 0.0  ;;  %v956_v4 = vmax.f32 %v906_v59, 0.0 }
 0x10f   :  { %v969_v50 = vmax.f32 %v727_v61, %v953_v52  ;;  %v713_v8 = vmax.f32 %v659_v62, 0.0  ;;  %v955_v9 = vmax.f32 %v901_v1, 0.0  ;;  %v1284_v10 = vpop.f32.mrb[24].mxu0  ;;  %v1316_v11 = vpop.f32.mrb[24].mxu1 }
 0x110   :  { %986 = vst [vmem:[%s1844_s3 + $0x28] sm:$0xff] %v970_v2  ;;  %v730_v12 = vmax.f32 %v1709_v0, %v714_v3  ;;  %v674_v55 = vadd.f32 %v1284_v10, %v1679_v7  ;;  %v668_v13 = vpop.f32.mrb[25].mxu0  ;;  %v916_v14 = vadd.f32 %v1316_v11, %v1679_v7  ;;  %v910_v16 = vpop.f32.mrb[25].mxu1 }
 0x111   :  { %985 = vst [vmem:[%s1844_s3 + $0x20] sm:$0xff] %v969_v50  ;;  %v729_v17 = vmax.f32 %v1713_v5, %v713_v8  ;;  %v669_v18 = vadd.f32 %v1679_v7, %v668_v13  ;;  %v911_v19 = vadd.f32 %v1679_v7, %v910_v16 }
 0x112   :  { %v972_v21 = vmax.f32 %v730_v12, %v956_v4  ;;  %v716_v23 = vmax.f32 %v674_v55, 0.0  ;;  %v958_v24 = vmax.f32 %v916_v14, 0.0 }
 0x113   :  { %v971_v0 = vmax.f32 %v729_v17, %v955_v9  ;;  %v715_v25 = vmax.f32 %v669_v18, 0.0  ;;  %v957_v26 = vmax.f32 %v911_v19, 0.0  ;;  %v1287_v28 = vpop.f32.mrb[26].mxu0  ;;  %v1319_v29 = vpop.f32.mrb[26].mxu1 }
 0x114   :  { %988 = vst [vmem:[%s1844_s3 + $0x38] sm:$0xff] %v972_v21  ;;  %v732_v30 = vmax.f32 %v1717_v15, %v716_v23  ;;  %v684_v5 = vadd.f32 %v1287_v28, %v1679_v7  ;;  %v678_v32 = vpop.f32.mrb[27].mxu0  ;;  %v926_v33 = vadd.f32 %v1319_v29, %v1679_v7  ;;  %v920_v34 = vpop.f32.mrb[27].mxu1 }
 0x115   :  { %987 = vst [vmem:[%s1844_s3 + $0x30] sm:$0xff] %v971_v0  ;;  %v731_v35 = vmax.f32 %v1721_v20, %v715_v25  ;;  %v679_v22 = vadd.f32 %v1679_v7, %v678_v32  ;;  %v921_v38 = vadd.f32 %v1679_v7, %v920_v34 }
 0x116   :  { %v974_v27 = vmax.f32 %v732_v30, %v958_v24  ;;  %v718_v39 = vmax.f32 %v684_v5, 0.0  ;;  %v960_v40 = vmax.f32 %v926_v33, 0.0 }
 0x117   :  { %v973_v15 = vmax.f32 %v731_v35, %v957_v26  ;;  %v717_v42 = vmax.f32 %v679_v22, 0.0  ;;  %v959_v43 = vmax.f32 %v921_v38, 0.0  ;;  %v1290_v44 = vpop.f32.mrb[28].mxu0  ;;  %v1322_v45 = vpop.f32.mrb[28].mxu1 }
 0x118   :  { %990 = vst [vmem:[%s1844_s3 + $0x48] sm:$0xff] %v974_v27  ;;  %v734_v46 = vmax.f32 %v1725_v31, %v718_v39  ;;  %v694_v20 = vadd.f32 %v1290_v44, %v1679_v7  ;;  %v688_v48 = vpop.f32.mrb[29].mxu0  ;;  %v936_v49 = vadd.f32 %v1322_v45, %v1679_v7  ;;  %v930_v36 = vpop.f32.mrb[29].mxu1 }
 0x119   :  { %989 = vst [vmem:[%s1844_s3 + $0x40] sm:$0xff] %v973_v15  ;;  %v733_v51 = vmax.f32 %v1729_v37, %v717_v42  ;;  %v689_v52 = vadd.f32 %v1679_v7, %v688_v48  ;;  %v931_v54 = vadd.f32 %v1679_v7, %v930_v36 }
 0x11a   :  { %v976_v56 = vmax.f32 %v734_v46, %v960_v40  ;;  %v720_v57 = vmax.f32 %v694_v20, 0.0  ;;  %v962_v41 = vmax.f32 %v936_v49, 0.0 }
 0x11b   :  { %v975_v31 = vmax.f32 %v733_v51, %v959_v43  ;;  %v719_v58 = vmax.f32 %v689_v52, 0.0  ;;  %v961_v59 = vmax.f32 %v931_v54, 0.0  ;;  %v1293_v60 = vpop.f32.mrb[30].mxu0  ;;  %v1325_v61 = vpop.f32.mrb[30].mxu1 }
 0x11c   :  { %992 = vst [vmem:[%s1844_s3 + $0x58] sm:$0xff] %v976_v56  ;;  %v736_v62 = vmax.f32 %v1733_v47, %v720_v57  ;;  %v704_v37 = vadd.f32 %v1293_v60, %v1679_v7  ;;  %v698_v1 = vpop.f32.mrb[31].mxu0  ;;  %v946_v2 = vadd.f32 %v1325_v61, %v1679_v7  ;;  %v940_v3 = vpop.f32.mrb[31].mxu1 }
 0x11d   :  { %991 = vst [vmem:[%s1844_s3 + $0x50] sm:$0xff] %v975_v31  ;;  %v735_v4 = vmax.f32 %v1737_v53, %v719_v58  ;;  %v699_v50 = vadd.f32 %v1679_v7, %v698_v1  ;;  %v941_v8 = vadd.f32 %v1679_v7, %v940_v3 }
 0x11e   :  { %v978_v9 = vmax.f32 %v736_v62, %v962_v41  ;;  %v722_v10 = vmax.f32 %v704_v37, 0.0  ;;  %v964_v11 = vmax.f32 %v946_v2, 0.0 }
 0x11f   :  { %v977_v47 = vmax.f32 %v735_v4, %v961_v59  ;;  %v721_v12 = vmax.f32 %v699_v50, 0.0  ;;  %v963_v55 = vmax.f32 %v941_v8, 0.0 }
 0x120   :  { %994 = vst [vmem:[%s1844_s3 + $0x68] sm:$0xff] %v978_v9  ;;  %v738_v13 = vmax.f32 %v1741_v63, %v722_v10 }
 0x121   :  { %993 = vst [vmem:[%s1844_s3 + $0x60] sm:$0xff] %v977_v47  ;;  %v737_v53 = vmax.f32 %v1745_v6, %v721_v12 }
 0x122   :  { %v980_v14 = vmax.f32 %v738_v13, %v964_v11 }
 0x123   :  { %v979_v7 = vmax.f32 %v737_v53, %v963_v55 }
 0x124   :  { %996 = vst [vmem:[%s1844_s3 + $0x78] sm:$0xff] %v980_v14 }
 0x125   :  { %995 = vst [vmem:[%s1844_s3 + $0x70] sm:$0xff] %v979_v7 }

// kernel: _lambda_.4
= control target key start
LH: loop header
LB: loop body
LE: loop exit
PB: predicated region body
PF: predicated region fallthrough
CT: control target
= control target key end

     0   :  { %vm34_vm0 = vcmask 588800   ;;  %s841_s1 = inlined_call_operand.vmem [shape: f32[72,128], index: 1, kind: input, shape index: {}]   ;;  %s842_s0 = inlined_call_operand.vmem [shape: f32[4,32,72], index: 0, kind: input, shape index: {}]   ;;  %s843_s2 = inlined_call_operand.vmem [shape: f32[1,128], index: 2, kind: input, shape index: {}]   ;;  %s844_s3 = inlined_call_operand.vmem [shape: f32[32,128], index: 3, kind: output, shape index: {}]  }
   0x1   :  { %v14_v0 = vld [vmem:[%s841_s1] sm:$0xff]  ;;  %v15_v1 = vld [vmem:[%s841_s1 + $0x8] sm:$0xff]  ;;  %v16_v2 = vld [vmem:[%s841_s1 + $0x10] sm:$0xff] }
   0x2   :  { %v651_v3 = vpack.c.bf16 %v15_v1, %v14_v0  ;;  %v17_v4 = vld [vmem:[%s841_s1 + $0x18] sm:$0xff]  ;;  %v18_v6 = vld [vmem:[%s841_s1 + $0x20] sm:$0xff]  ;;  %v19_v7 = vld [vmem:[%s841_s1 + $0x28] sm:$0xff] }
   0x3   :  { %v655_v5 = vpack.c.bf16 %v17_v4, %v16_v2  ;;  %v24_v8 = vld [vmem:[%s842_s0] sm:$0xff]  ;;  %v659_v10 = vpack.c.bf16 %v19_v7, %v18_v6  ;;  %v20_v11 = vld [vmem:[%s841_s1 + $0x30] sm:$0xff]  ;;  %v21_v12 = vld [vmem:[%s841_s1 + $0x38] sm:$0xff] }
   0x4   :  { %652 = vmatprep.subr.bf16.mxu0 %v651_v3  ;;  %668 = vmatprep.subr.bf16.mxu1 %v651_v3  ;;  %v479_v9 = vld [vmem:[%s842_s0 + $0x20] sm:$0xff]  ;;  %v663_v13 = vpack.c.bf16 %v21_v12, %v20_v11  ;;  %v25_v15 = vld [vmem:[%s842_s0 + $0x8] sm:$0xff]  ;;  %v26_v17 = vld [vmem:[%s842_s0 + $0x10] sm:$0xff] }
   0x5   :  { %654 = vmatpush3.bf16.msra.mxu0 %v651_v3  ;;  %670 = vmatpush3.bf16.msra.mxu1 %v651_v3  ;;  %v22_v14 = vld [vmem:[%s841_s1 + $0x40] sm:$0xff]  ;;  %v480_v16 = vld [vmem:[%s842_s0 + $0x28] sm:$0xff]  ;;  %v481_v18 = vld [vmem:[%s842_s0 + $0x30] sm:$0xff] }
   0x6   :  { %656 = vmatprep.subr.bf16.mxu0 %v655_v5  ;;  %672 = vmatprep.subr.bf16.mxu1 %v655_v5  ;;  %v27_v19 = vld [vmem:[%s842_s0 + $0x18] sm:$0xff]  ;;  %v487_v21 = vld [vmem:[%s842_s0 + $0x40] sm:$0xff]  ;;  %v488_v23 = vld [vmem:[%s842_s0 + $0x48] sm:$0xff] }
   0x7   :  { %573 = vmatprep.mubr.msk.f32.mxu0 %vm34_vm0, %v24_v8  ;;  %597 = vmatprep.mubr.msk.f32.mxu1 %vm34_vm0, %v479_v9  ;;  %v482_v20 = vld [vmem:[%s842_s0 + $0x38] sm:$0xff]  ;;  %v495_v22 = vld [vmem:[%s842_s0 + $0x60] sm:$0xff]  ;;  %v496_v24 = vld [vmem:[%s842_s0 + $0x68] sm:$0xff] }
   0x8   :  { %v489_v25 = vld [vmem:[%s842_s0 + $0x50] sm:$0xff]  ;;  %v490_v27 = vld [vmem:[%s842_s0 + $0x58] sm:$0xff]  ;;  %v474_v29 = vld [vmem:[%s843_s2] ss:$0 sm:$0xff] }
   0x9   :  { %658 = vmatpush3.bf16.msra.mxu0 %v655_v5  ;;  %674 = vmatpush3.bf16.msra.mxu1 %v655_v5  ;;  %v497_v26 = vld [vmem:[%s842_s0 + $0x70] sm:$0xff]  ;;  %v498_v28 = vld [vmem:[%s842_s0 + $0x78] sm:$0xff] }
   0xa   :  { %660 = vmatprep.subr.bf16.mxu0 %v659_v10  ;;  %676 = vmatprep.subr.bf16.mxu1 %v659_v10 }
   0xd   :  { %662 = vmatpush3.bf16.msra.mxu0 %v659_v10  ;;  %678 = vmatpush3.bf16.msra.mxu1 %v659_v10 }
   0xe   :  { %664 = vmatprep.subr.bf16.mxu0 %v663_v13  ;;  %680 = vmatprep.subr.bf16.mxu1 %v663_v13 }
  0x11   :  { %666 = vmatpush3.bf16.msra.mxu0 %v663_v13  ;;  %682 = vmatpush3.bf16.msra.mxu1 %v663_v13 }
  0x12   :  { %571 = vmatprep.subr.mxu0 %v22_v14  ;;  %595 = vmatprep.subr.mxu1 %v22_v14 }
  0x15   :  { %572 = vmatpush3.msra.mxu0 %v22_v14  ;;  %596 = vmatpush3.msra.mxu1 %v22_v14 }
  0x16   :  { %574 = vmatmul.mubr.msk.f32.vlgmr.msra.gmra.mrb[0].mxu0 %vm34_vm0, %v25_v15  ;;  %598 = vmatmul.mubr.msk.f32.vlgmr.msra.gmra.mrb[0].mxu1 %vm34_vm0, %v480_v16 }
  0x17   :  { %684 = vmatprep.subr.bf16.mxu0 %v651_v3  ;;  %700 = vmatprep.subr.bf16.mxu1 %v651_v3 }
  0x18   :  { %686 = vmatpush3.bf16.msra.mxu0 %v651_v3  ;;  %702 = vmatpush3.bf16.msra.mxu1 %v651_v3 }
  0x19   :  { %688 = vmatprep.subr.bf16.mxu0 %v655_v5  ;;  %704 = vmatprep.subr.bf16.mxu1 %v655_v5 }
  0x1a   :  { %576 = vmatprep.mubr.msk.f32.mxu0 %vm34_vm0, %v26_v17  ;;  %600 = vmatprep.mubr.msk.f32.mxu1 %vm34_vm0, %v481_v18 }
  0x1b   :  { %577 = vmatmul.mubr.msk.f32.gmra.mrb[2].mxu0 %vm34_vm0, %v27_v19  ;;  %601 = vmatmul.mubr.msk.f32.gmra.mrb[2].mxu1 %vm34_vm0, %v482_v20 }
  0x1c   :  { %690 = vmatpush3.bf16.msra.mxu0 %v655_v5  ;;  %706 = vmatpush3.bf16.msra.mxu1 %v655_v5 }
  0x1d   :  { %692 = vmatprep.subr.bf16.mxu0 %v659_v10  ;;  %708 = vmatprep.subr.bf16.mxu1 %v659_v10 }
  0x1e   :  { %621 = vmatprep.mubr.msk.f32.mxu0 %vm34_vm0, %v487_v21  ;;  %645 = vmatprep.mubr.msk.f32.mxu1 %vm34_vm0, %v495_v22 }
  0x20   :  { %694 = vmatpush3.bf16.msra.mxu0 %v659_v10  ;;  %710 = vmatpush3.bf16.msra.mxu1 %v659_v10 }
  0x21   :  { %696 = vmatprep.subr.bf16.mxu0 %v663_v13  ;;  %712 = vmatprep.subr.bf16.mxu1 %v663_v13 }
  0x24   :  { %698 = vmatpush3.bf16.msra.mxu0 %v663_v13  ;;  %714 = vmatpush3.bf16.msra.mxu1 %v663_v13 }
  0x25   :  { %619 = vmatprep.subr.mxu0 %v22_v14  ;;  %643 = vmatprep.subr.mxu1 %v22_v14 }
  0x28   :  { %620 = vmatpush3.msra.mxu0 %v22_v14  ;;  %644 = vmatpush3.msra.mxu1 %v22_v14 }
  0x29   :  { %622 = vmatmul.mubr.msk.f32.vlgmr.msra.gmra.mrb[4].mxu0 %vm34_vm0, %v488_v23  ;;  %646 = vmatmul.mubr.msk.f32.vlgmr.msra.gmra.mrb[4].mxu1 %vm34_vm0, %v496_v24 }
  0x2a   :  { %624 = vmatprep.mubr.msk.f32.mxu0 %vm34_vm0, %v489_v25  ;;  %648 = vmatprep.mubr.msk.f32.mxu1 %vm34_vm0, %v497_v26 }
  0x2d   :  { %625 = vmatmul.mubr.msk.f32.gmra.mrb[6].mxu0 %vm34_vm0, %v490_v27  ;;  %649 = vmatmul.mubr.msk.f32.gmra.mrb[6].mxu1 %vm34_vm0, %v498_v28 }
  0xe9   :  { %v575_v30 = vpop.f32.mrb[0].mxu0  ;;  %v599_v31 = vpop.f32.mrb[0].mxu1 }
  0xea   :  { %v119_v32 = vadd.f32 %v575_v30, %v474_v29  ;;  %v225_v33 = vadd.f32 %v599_v31, %v474_v29  ;;  %v113_v34 = vpop.f32.mrb[1].mxu0  ;;  %v219_v35 = vpop.f32.mrb[1].mxu1 }
  0xeb   :  { %v114_v36 = vadd.f32 %v474_v29, %v113_v34  ;;  %v220_v37 = vadd.f32 %v474_v29, %v219_v35 }
  0xec   :  { %v133_v38 = vmax.f32 %v119_v32, 0.0  ;;  %v239_v39 = vmax.f32 %v225_v33, 0.0 }
  0xed   :  { %v132_v40 = vmax.f32 %v114_v36, 0.0  ;;  %v238_v41 = vmax.f32 %v220_v37, 0.0 }
  0xee   :  { %v243_v42 = vmax.f32 %v133_v38, %v239_v39  ;;  %v578_v43 = vpop.f32.mrb[2].mxu0  ;;  %v602_v44 = vpop.f32.mrb[2].mxu1 }
  0xef   :  { %v242_v45 = vmax.f32 %v132_v40, %v238_v41  ;;  %v129_v46 = vadd.f32 %v578_v43, %v474_v29  ;;  %v235_v47 = vadd.f32 %v602_v44, %v474_v29  ;;  %v123_v48 = vpop.f32.mrb[3].mxu0  ;;  %v229_v49 = vpop.f32.mrb[3].mxu1 }
  0xf0   :  { %v124_v50 = vadd.f32 %v474_v29, %v123_v48  ;;  %v230_v51 = vadd.f32 %v474_v29, %v229_v49 }
  0xf1   :  { %v135_v52 = vmax.f32 %v129_v46, 0.0  ;;  %v241_v53 = vmax.f32 %v235_v47, 0.0 }
  0xf2   :  { %v134_v54 = vmax.f32 %v124_v50, 0.0  ;;  %v240_v55 = vmax.f32 %v230_v51, 0.0 }
  0xf3   :  { %v245_v56 = vmax.f32 %v135_v52, %v241_v53 }
  0xf4   :  { %v244_v57 = vmax.f32 %v134_v54, %v240_v55 }
  0xfc   :  { %v623_v58 = vpop.f32.mrb[4].mxu0  ;;  %v647_v59 = vpop.f32.mrb[4].mxu1 }
  0xfd   :  { %v335_v60 = vadd.f32 %v623_v58, %v474_v29  ;;  %v329_v61 = vpop.f32.mrb[5].mxu0  ;;  %v445_v62 = vadd.f32 %v647_v59, %v474_v29  ;;  %v439_v63 = vpop.f32.mrb[5].mxu1 }
  0xfe   :  { %v330_v0 = vadd.f32 %v474_v29, %v329_v61  ;;  %v440_v1 = vadd.f32 %v474_v29, %v439_v63 }
  0xff   :  { %v349_v2 = vmax.f32 %v335_v60, 0.0  ;;  %v459_v3 = vmax.f32 %v445_v62, 0.0 }
 0x100   :  { %v348_v4 = vmax.f32 %v330_v0, 0.0  ;;  %v458_v5 = vmax.f32 %v440_v1, 0.0  ;;  %v626_v6 = vpop.f32.mrb[6].mxu0  ;;  %v650_v7 = vpop.f32.mrb[6].mxu1 }
 0x101   :  { %v353_v8 = vmax.f32 %v243_v42, %v349_v2  ;;  %v345_v9 = vadd.f32 %v626_v6, %v474_v29  ;;  %v339_v10 = vpop.f32.mrb[7].mxu0  ;;  %v455_v11 = vadd.f32 %v650_v7, %v474_v29  ;;  %v449_v12 = vpop.f32.mrb[7].mxu1 }
 0x102   :  { %v352_v13 = vmax.f32 %v242_v45, %v348_v4  ;;  %v340_v14 = vadd.f32 %v474_v29, %v339_v10  ;;  %v450_v15 = vadd.f32 %v474_v29, %v449_v12 }
 0x103   :  { %v463_v16 = vmax.f32 %v353_v8, %v459_v3  ;;  %v351_v17 = vmax.f32 %v345_v9, 0.0  ;;  %v461_v18 = vmax.f32 %v455_v11, 0.0 }
 0x104   :  { %v462_v19 = vmax.f32 %v352_v13, %v458_v5  ;;  %v350_v20 = vmax.f32 %v340_v14, 0.0  ;;  %v460_v21 = vmax.f32 %v450_v15, 0.0 }
 0x105   :  { %467 = vst [vmem:[%s844_s3 + $0x8] sm:$0xff] %v463_v16  ;;  %v355_v22 = vmax.f32 %v245_v56, %v351_v17 }
 0x106   :  { %466 = vst [vmem:[%s844_s3] sm:$0xff] %v462_v19  ;;  %v354_v23 = vmax.f32 %v244_v57, %v350_v20 }
 0x107   :  { %v465_v24 = vmax.f32 %v355_v22, %v461_v18 }
 0x108   :  { %v464_v25 = vmax.f32 %v354_v23, %v460_v21 }
 0x109   :  { %469 = vst [vmem:[%s844_s3 + $0x18] sm:$0xff] %v465_v24 }
 0x10a   :  { %468 = vst [vmem:[%s844_s3 + $0x10] sm:$0xff] %v464_v25 }

// kernel: _lambda_.5
= control target key start
LH: loop header
LB: loop body
LE: loop exit
PB: predicated region body
PF: predicated region fallthrough
CT: control target
= control target key end

     0   :  { %v475_v0 = vmov 0.0|0.0   ;;  %vm41_vm0 = vcmask 130048   ;;  %s638_s1 = inlined_call_operand.vmem [shape: f32[144,128], index: 1, kind: input, shape index: {}]   ;;  %s639_s0 = inlined_call_operand.vmem [shape: f32[4,8,144], index: 0, kind: input, shape index: {}]   ;;  %s640_s2 = inlined_call_operand.vmem [shape: f32[1,128], index: 2, kind: input, shape index: {}]   ;;  %s641_s3 = inlined_call_operand.vmem [shape: f32[8,128], index: 3, kind: output, shape index: {}]  }
   0x1   :  { %366 = vmatprep.subr.bf16.mxu0 %v475_v0  ;;  %v14_v1 = vld [vmem:[%s638_s1] sm:$0xff]  ;;  %v15_v2 = vld [vmem:[%s638_s1 + $0x8] sm:$0xff]  ;;  %393 = vmatprep.subr.bf16.mxu1 %v475_v0  ;;  %v16_v3 = vld [vmem:[%s638_s1 + $0x10] sm:$0xff] }
   0x2   :  { %v507_v4 = vpack.c.bf16 %v15_v2, %v14_v1  ;;  %v17_v5 = vld [vmem:[%s638_s1 + $0x18] sm:$0xff]  ;;  %v18_v7 = vld [vmem:[%s638_s1 + $0x20] sm:$0xff]  ;;  %v19_v8 = vld [vmem:[%s638_s1 + $0x28] sm:$0xff] }
   0x3   :  { %v514_v6 = vpack.c.bf16 %v17_v5, %v16_v3  ;;  %v34_v9 = vld [vmem:[%s639_s0 + $0x8] sm:$0xff]  ;;  %v358_v10 = vld [vmem:[%s639_s0 + $0x18] sm:$0xff]  ;;  %v532_v11 = vpack.c.bf16 %v19_v8, %v18_v7  ;;  %v20_v12 = vld [vmem:[%s638_s1 + $0x30] sm:$0xff] }
   0x4   :  { %368 = vmatpush1.bf16.msra.mxu0 %v507_v4  ;;  %395 = vmatpush1.bf16.msra.mxu1 %v507_v4  ;;  %v21_v13 = vld [vmem:[%s638_s1 + $0x38] sm:$0xff]  ;;  %v22_v15 = vld [vmem:[%s638_s1 + $0x40] sm:$0xff]  ;;  %v23_v16 = vld [vmem:[%s638_s1 + $0x48] sm:$0xff] }
   0x5   :  { %369 = vmatprep.subr.bf16.mxu0 %v475_v0  ;;  %396 = vmatprep.subr.bf16.mxu1 %v475_v0  ;;  %v376_v14 = vpack.c.bf16 %v21_v13, %v20_v12  ;;  %v379_v17 = vpack.c.bf16 %v23_v16, %v22_v15  ;;  %v24_v18 = vld [vmem:[%s638_s1 + $0x50] sm:$0xff]  ;;  %v25_v19 = vld [vmem:[%s638_s1 + $0x58] sm:$0xff]  ;;  %v26_v21 = vld [vmem:[%s638_s1 + $0x60] sm:$0xff] }
   0x6   :  { %356 = vmatprep.mubr.msk.f32.mxu0 %vm41_vm0, %v34_v9  ;;  %359 = vmatprep.mubr.msk.f32.mxu1 %vm41_vm0, %v358_v10  ;;  %v382_v20 = vpack.c.bf16 %v25_v19, %v24_v18  ;;  %v27_v22 = vld [vmem:[%s638_s1 + $0x68] sm:$0xff]  ;;  %v28_v24 = vld [vmem:[%s638_s1 + $0x70] sm:$0xff]  ;;  %v29_v25 = vld [vmem:[%s638_s1 + $0x78] sm:$0xff] }
   0x7   :  { %v385_v23 = vpack.c.bf16 %v27_v22, %v26_v21  ;;  %v388_v26 = vpack.c.bf16 %v29_v25, %v28_v24  ;;  %v30_v27 = vld [vmem:[%s638_s1 + $0x80] sm:$0xff]  ;;  %v31_v28 = vld [vmem:[%s638_s1 + $0x88] sm:$0xff]  ;;  %v357_v31 = vld [vmem:[%s639_s0 + $0x10] sm:$0xff] }
   0x8   :  { %371 = vmatpush1.bf16.msra.mxu0 %v514_v6  ;;  %398 = vmatpush1.bf16.msra.mxu1 %v514_v6  ;;  %v391_v29 = vpack.c.bf16 %v31_v28, %v30_v27  ;;  %v33_v30 = vld [vmem:[%s639_s0] sm:$0xff]  ;;  %v361_v32 = vld [vmem:[%s639_s0 + $0x28] sm:$0xff]  ;;  %v364_v33 = vld [vmem:[%s639_s0 + $0x38] sm:$0xff] }
   0x9   :  { %372 = vmatprep.subr.bf16.mxu0 %v475_v0  ;;  %399 = vmatprep.subr.bf16.mxu1 %v475_v0  ;;  %v360_v34 = vld [vmem:[%s639_s0 + $0x20] sm:$0xff]  ;;  %v363_v35 = vld [vmem:[%s639_s0 + $0x30] sm:$0xff] }
   0xa   :  { %v355_v36 = vld [vmem:[%s640_s2] ss:$0 sm:$0xff] }
   0xc   :  { %374 = vmatpush1.bf16.msra.mxu0 %v532_v11  ;;  %401 = vmatpush1.bf16.msra.mxu1 %v532_v11 }
   0xd   :  { %375 = vmatprep.subr.bf16.mxu0 %v475_v0  ;;  %402 = vmatprep.subr.bf16.mxu1 %v475_v0 }
  0x10   :  { %377 = vmatpush1.bf16.msra.mxu0 %v376_v14  ;;  %404 = vmatpush1.bf16.msra.mxu1 %v376_v14 }
  0x11   :  { %378 = vmatprep.subr.bf16.mxu0 %v475_v0  ;;  %405 = vmatprep.subr.bf16.mxu1 %v475_v0 }
  0x14   :  { %380 = vmatpush1.bf16.msra.mxu0 %v379_v17  ;;  %407 = vmatpush1.bf16.msra.mxu1 %v379_v17 }
  0x15   :  { %381 = vmatprep.subr.bf16.mxu0 %v475_v0  ;;  %408 = vmatprep.subr.bf16.mxu1 %v475_v0 }
  0x18   :  { %383 = vmatpush1.bf16.msra.mxu0 %v382_v20  ;;  %410 = vmatpush1.bf16.msra.mxu1 %v382_v20 }
  0x19   :  { %384 = vmatprep.subr.bf16.mxu0 %v475_v0  ;;  %411 = vmatprep.subr.bf16.mxu1 %v475_v0 }
  0x1c   :  { %386 = vmatpush1.bf16.msra.mxu0 %v385_v23  ;;  %413 = vmatpush1.bf16.msra.mxu1 %v385_v23 }
  0x1d   :  { %387 = vmatprep.subr.bf16.mxu0 %v475_v0  ;;  %414 = vmatprep.subr.bf16.mxu1 %v475_v0 }
  0x20   :  { %389 = vmatpush1.bf16.msra.mxu0 %v388_v26  ;;  %416 = vmatpush1.bf16.msra.mxu1 %v388_v26 }
  0x21   :  { %390 = vmatprep.subr.bf16.mxu0 %v475_v0  ;;  %417 = vmatprep.subr.bf16.mxu1 %v475_v0 }
  0x24   :  { %392 = vmatpush1.bf16.msra.mxu0 %v391_v29  ;;  %419 = vmatpush1.bf16.msra.mxu1 %v391_v29 }
  0x25   :  { %420 = vmatprep.subr.bf16.mxu0 %v475_v0  ;;  %447 = vmatprep.subr.bf16.mxu1 %v475_v0 }
  0x27   :  { %110 = vmatmul.mubr.f32.vlgmr.msra.gmra.mrb[0].mxu0 %v33_v30  ;;  %187 = vmatmul.mubr.f32.vlgmr.msra.gmra.mrb[0].mxu1 %v357_v31 }
  0x28   :  { %422 = vmatpush1.bf16.msra.mxu0 %v507_v4  ;;  %449 = vmatpush1.bf16.msra.mxu1 %v507_v4 }
  0x29   :  { %423 = vmatprep.subr.bf16.mxu0 %v475_v0  ;;  %450 = vmatprep.subr.bf16.mxu1 %v475_v0 }
  0x2a   :  { %362 = vmatprep.mubr.msk.f32.mxu0 %vm41_vm0, %v361_v32  ;;  %365 = vmatprep.mubr.msk.f32.mxu1 %vm41_vm0, %v364_v33 }
  0x2c   :  { %425 = vmatpush1.bf16.msra.mxu0 %v514_v6  ;;  %452 = vmatpush1.bf16.msra.mxu1 %v514_v6 }
  0x2d   :  { %426 = vmatprep.subr.bf16.mxu0 %v475_v0  ;;  %453 = vmatprep.subr.bf16.mxu1 %v475_v0 }
  0x30   :  { %428 = vmatpush1.bf16.msra.mxu0 %v532_v11  ;;  %455 = vmatpush1.bf16.msra.mxu1 %v532_v11 }
  0x31   :  { %429 = vmatprep.subr.bf16.mxu0 %v475_v0  ;;  %456 = vmatprep.subr.bf16.mxu1 %v475_v0 }
  0x34   :  { %431 = vmatpush1.bf16.msra.mxu0 %v376_v14  ;;  %458 = vmatpush1.bf16.msra.mxu1 %v376_v14 }
  0x35   :  { %432 = vmatprep.subr.bf16.mxu0 %v475_v0  ;;  %459 = vmatprep.subr.bf16.mxu1 %v475_v0 }
  0x38   :  { %434 = vmatpush1.bf16.msra.mxu0 %v379_v17  ;;  %461 = vmatpush1.bf16.msra.mxu1 %v379_v17 }
  0x39   :  { %435 = vmatprep.subr.bf16.mxu0 %v475_v0  ;;  %462 = vmatprep.subr.bf16.mxu1 %v475_v0 }
  0x3c   :  { %437 = vmatpush1.bf16.msra.mxu0 %v382_v20  ;;  %464 = vmatpush1.bf16.msra.mxu1 %v382_v20 }
  0x3d   :  { %438 = vmatprep.subr.bf16.mxu0 %v475_v0  ;;  %465 = vmatprep.subr.bf16.mxu1 %v475_v0 }
  0x40   :  { %440 = vmatpush1.bf16.msra.mxu0 %v385_v23  ;;  %467 = vmatpush1.bf16.msra.mxu1 %v385_v23 }
  0x41   :  { %441 = vmatprep.subr.bf16.mxu0 %v475_v0  ;;  %468 = vmatprep.subr.bf16.mxu1 %v475_v0 }
  0x44   :  { %443 = vmatpush1.bf16.msra.mxu0 %v388_v26  ;;  %470 = vmatpush1.bf16.msra.mxu1 %v388_v26 }
  0x45   :  { %444 = vmatprep.subr.bf16.mxu0 %v475_v0  ;;  %471 = vmatprep.subr.bf16.mxu1 %v475_v0 }
  0x48   :  { %446 = vmatpush1.bf16.msra.mxu0 %v391_v29  ;;  %473 = vmatpush1.bf16.msra.mxu1 %v391_v29 }
  0x4b   :  { %265 = vmatmul.mubr.f32.vlgmr.msra.gmra.mrb[2].mxu0 %v360_v34  ;;  %343 = vmatmul.mubr.f32.vlgmr.msra.gmra.mrb[2].mxu1 %v363_v35 }
  0xfa   :  { %v111_v37 = vpop.f32.mrb[0].mxu0  ;;  %v188_v38 = vpop.f32.mrb[0].mxu1 }
  0xfb   :  { %v112_v39 = vadd.f32 %v355_v36, %v111_v37  ;;  %v113_v40 = vpop.f32.mrb[1].mxu0  ;;  %v189_v41 = vadd.f32 %v355_v36, %v188_v38  ;;  %v190_v42 = vpop.f32.mrb[1].mxu1 }
  0xfd   :  { %v115_v43 = vmax.f32 %v112_v39, 0.0  ;;  %v192_v44 = vmax.f32 %v189_v41, 0.0 }
  0xff   :  { %v193_v45 = vmax.f32 %v115_v43, %v192_v44 }
 0x11e   :  { %v266_v46 = vpop.f32.mrb[2].mxu0  ;;  %v344_v47 = vpop.f32.mrb[2].mxu1 }
 0x11f   :  { %v267_v48 = vadd.f32 %v355_v36, %v266_v46  ;;  %v268_v49 = vpop.f32.mrb[3].mxu0  ;;  %v345_v50 = vadd.f32 %v355_v36, %v344_v47  ;;  %v346_v51 = vpop.f32.mrb[3].mxu1 }
 0x121   :  { %v270_v52 = vmax.f32 %v267_v48, 0.0  ;;  %v348_v53 = vmax.f32 %v345_v50, 0.0 }
 0x123   :  { %v271_v54 = vmax.f32 %v193_v45, %v270_v52 }
 0x125   :  { %v349_v55 = vmax.f32 %v271_v54, %v348_v53 }
 0x127   :  { %350 = vst [vmem:[%s641_s3] sm:$0xff] %v349_v55 }

</bundles_post_ra>
